<compile_context>
chip_gen: v7x
topology: tpu7x:2x2x1
jax: 0.10.0
libtpu: 0.0.40
codegen_flags: <defaults>
</compile_context>

<pallas_src>
import functools

import jax
import jax.numpy as jnp
from jax import lax
from jax.experimental import pallas as pl
from jax.experimental.pallas import tpu as pltpu


def _rmsnorm_kernel(x_ref, w_ref, o_ref, *, eps, match_torch_cast):
    # PyTorch semantics:
    #   x32 = x.float(); ms = mean(x32**2, -1, keepdim=True)
    #   xn  = x32 * rsqrt(ms + eps)
    #   out = w * xn.to(x.dtype)
    x32 = x_ref[...].astype(jnp.float32)                  # (tm, D) f32
    ms = jnp.mean(x32 * x32, axis=-1, keepdims=True)      # (tm, 1) f32
    xn = x32 * lax.rsqrt(ms + eps)                        # rsqrt -> EUP slot
    if match_torch_cast and x_ref.dtype != jnp.float32:
        # Bit-match PyTorch's x.to(dtype) round-trip for sub-f32 inputs only.
        xn = xn.astype(x_ref.dtype).astype(jnp.float32)
    o_ref[...] = (w_ref[...] * xn).astype(o_ref.dtype)


# bytes-per-element -> sublane packing multiple for the row tile
_SUBLANE_MULT = {1: 32, 2: 16, 4: 8}


def _chip_profile():
    """Returns (vmem_capacity_bytes, multi_tensorcore_chip)."""
    vmem_cap = 64 << 20          # conservative fallback (v7x per-TC VMEM)
    multi_tc = False
    try:
        vmem_cap = int(pltpu.get_tpu_info().vmem_capacity_bytes)
    except Exception:
        pass
    try:
        kind = (jax.devices()[0].device_kind or "").lower()
        # v7x has 2 TensorCores per chip; v4/v5p megacore also shards the
        # "parallel" grid axis.  v5e / v6e are single-TensorCore.
        multi_tc = any(tag in kind for tag in ("v7", "7x", "v4", "v5p"))
    except Exception:
        pass
    return vmem_cap, multi_tc


def tilt_layer_norm(x, w, eps=1e-6, *, out_dtype=None, match_torch_cast=True):
    """RMS norm over the last axis of `x`, scaled by `w` (shape (dim,))."""
    orig_shape = x.shape
    dim = orig_shape[-1]
    assert w.shape == (dim,)

    # PyTorch: `w * x_norm.to(x.dtype)` -> result dtype = promote(w, x).
    # Pass out_dtype=x.dtype explicitly to cut write bytes where strict
    # PyTorch promotion is not required (memory-bound kernel).
    if out_dtype is None:
        out_dtype = jnp.promote_types(w.dtype, x.dtype)

    x2d = x.reshape(-1, dim)
    rows = x2d.shape[0]

    in_bytes = jnp.dtype(x.dtype).itemsize
    out_bytes = jnp.dtype(out_dtype).itemsize
    sublane = _SUBLANE_MULT.get(in_bytes, 8)

    # ---- VMEM-budgeted row-tile selection (generation aware) ----------------
    vmem_cap, multi_tc = _chip_profile()
    max_row_tile = 512 if vmem_cap <= (64 << 20) else 1024
    budget = max(vmem_cap - (16 << 20), vmem_cap // 2)

    # Per-row VMEM: 2x double-buffered input, 2x double-buffered output, plus
    # two full-tile f32 temporaries (x32 upcast and the w*xn product).
    per_row = dim * (2 * in_bytes + 2 * out_bytes + 2 * 4)

    rows_up = pl.cdiv(rows, sublane) * sublane
    tm = min(max(budget // per_row, sublane), max_row_tile, rows_up)
    if multi_tc and rows_up >= 2 * sublane:
        # Two TensorCores share the grid: aim for >= ~8 grid steps so DMA
        # skew / tail imbalance cannot idle one core for long.
        tm = min(tm, pl.cdiv(rows_up, 8))
    tm = max((tm // sublane) * sublane, sublane)

    # ---- Tail handling: Pallas edge-block masking (no pad / slice) ----------
    # Garbage reads in the last partial block only affect masked-off output
    # rows; rows are independent, so valid rows are unaffected.
    grid = (pl.cdiv(rows, tm),)

    w2d = w.reshape(1, dim).astype(jnp.float32)

    # Explicit VMEM limit: in/out double buffers + 2 f32 temps + weight + slack.
    vmem_limit = (2 * tm * dim * in_bytes            # x double buffer
                  + 2 * tm * dim * out_bytes         # out double buffer
                  + 2 * tm * dim * 4                 # f32 temporaries
                  + 2 * dim * 4                      # weight buffers
                  + (2 << 20))                       # Mosaic internal scratch
    vmem_limit = int(min(max(vmem_limit, min(32 << 20, vmem_cap)), vmem_cap))

    out = pl.pallas_call(
        functools.partial(_rmsnorm_kernel, eps=eps,
                          match_torch_cast=match_torch_cast),
        out_shape=jax.ShapeDtypeStruct((rows, dim), out_dtype),
        grid_spec=pltpu.PrefetchScalarGridSpec(
            num_scalar_prefetch=0,
            grid=grid,
            in_specs=[
                pl.BlockSpec((tm, dim), lambda i: (i, 0)),   # x tile
                pl.BlockSpec((1, dim), lambda i: (0, 0)),    # weight (resident)
            ],
            out_specs=pl.BlockSpec((tm, dim), lambda i: (i, 0)),
        ),
        compiler_params=pltpu.CompilerParams(
            dimension_semantics=("parallel",),
            vmem_limit_bytes=vmem_limit,
        ),
    )(x2d, w2d)

    return out.reshape(orig_shape)


def _ref_rmsnorm(x, w, eps, match_torch_cast=True):
    x32 = x.astype(jnp.float32)
    xn = x32 * lax.rsqrt(jnp.mean(x32 * x32, axis=-1, keepdims=True) + eps)
    if match_torch_cast and x.dtype != jnp.float32:
        xn = xn.astype(x.dtype)
    return (w * xn).astype(jnp.promote_types(w.dtype, x.dtype))


if __name__ == "__main__":
    eps = 1e-6
    key = jax.random.PRNGKey(0)

    # --- Test 1: f32 input, shapes implied by the module (B, S, hidden) ------
    B, S, D = 2, 8, 32
    x = jax.random.normal(key, (B, S, D), dtype=jnp.float32)
    w = jnp.ones((D,), dtype=jnp.float32)   # init_weights(factor=1.0)

    out = jax.block_until_ready(tilt_layer_norm(x, w, eps=eps))
    ref = _ref_rmsnorm(x, w, eps)
    assert out.shape == ref.shape and out.dtype == ref.dtype
    assert jnp.allclose(out, ref, atol=1e-5, rtol=1e-5), "f32 mismatch vs reference"

    # --- Test 2: bf16 input (sublane-16 tiling + torch cast round-trip) ------
    D2 = 128
    x_bf = jax.random.normal(jax.random.PRNGKey(1), (B, S, D2),
                             dtype=jnp.float32).astype(jnp.bfloat16)
    w2 = jnp.ones((D2,), dtype=jnp.float32)

    out_bf = jax.block_until_ready(tilt_layer_norm(x_bf, w2, eps=eps))
    ref_bf = _ref_rmsnorm(x_bf, w2, eps)
    assert out_bf.dtype == jnp.float32
    assert jnp.allclose(out_bf, ref_bf, atol=1e-2, rtol=1e-2), "bf16 mismatch"

    # --- Test 3: rows not a multiple of the tile (edge-block masking path) ---
    x_odd = jax.random.normal(jax.random.PRNGKey(2), (3, 5, D2), dtype=jnp.float32)
    out_odd = jax.block_until_ready(tilt_layer_norm(x_odd, w2, eps=eps))
    ref_odd = _ref_rmsnorm(x_odd, w2, eps)
    assert out_odd.shape == ref_odd.shape
    assert jnp.allclose(out_odd, ref_odd, atol=1e-5, rtol=1e-5), "odd-rows mismatch"

    # --- Test 4: bf16-in / bf16-out override (halved write traffic path) -----
    out_bf16 = jax.block_until_ready(
        tilt_layer_norm(x_bf, w2, eps=eps, out_dtype=jnp.bfloat16))
    assert out_bf16.dtype == jnp.bfloat16
    assert jnp.allclose(out_bf16.astype(jnp.float32), ref_bf,
                        atol=2e-2, rtol=2e-2), "bf16-out mismatch"

    print("KERNEL_OK")
</pallas_src>

<mosaic_0001>
module attributes {stable_mosaic.version = 11 : i64} {
  func.func @_rmsnorm_kernel(%arg0: i32, %arg1: memref<16x32xf32, #tpu.memory_space<vmem>>, %arg2: memref<1x32xf32, #tpu.memory_space<vmem>>, %arg3: memref<16x32xf32, #tpu.memory_space<vmem>>) attributes {dimension_semantics = [#tpu.dimension_semantics<parallel>], iteration_bounds = array<i64: 1>, scalar_prefetch = 0 : i64, scratch_operands = 0 : i64, tpu.core_type = #tpu.core_type<tc>, window_params = [{transform_indices = @transform_0, window_bounds = array<i64: 16, 32>}, {pipeline_mode = #tpu.pipeline_mode<synchronous>, transform_indices = @transform_1, window_bounds = array<i64: 1, 32>}, {transform_indices = @transform_2, window_bounds = array<i64: 16, 32>}]} {
    %c0 = arith.constant 0 : index
    %c0_0 = arith.constant 0 : index
    %0 = vector.load %arg1[%c0, %c0_0] : memref<16x32xf32, #tpu.memory_space<vmem>>, vector<16x32xf32>
    %1 = arith.mulf %0, %0 : vector<16x32xf32>
    %cst = arith.constant dense<0.000000e+00> : vector<16xf32>
    %2 = vector.multi_reduction <add>, %1, %cst [1] : vector<16x32xf32> to vector<16xf32>
    %3 = vector.shape_cast %2 : vector<16xf32> to vector<16x1xf32>
    %cst_1 = arith.constant 3.200000e+01 : f32
    %4 = vector.broadcast %cst_1 : f32 to vector<16x1xf32>
    %5 = arith.divf %3, %4 : vector<16x1xf32>
    %cst_2 = arith.constant 9.99999997E-7 : f32
    %6 = vector.broadcast %cst_2 : f32 to vector<16x1xf32>
    %7 = arith.addf %5, %6 : vector<16x1xf32>
    %8 = math.rsqrt %7 : vector<16x1xf32>
    %9 = vector.broadcast %8 : vector<16x1xf32> to vector<16x32xf32>
    %10 = arith.mulf %0, %9 : vector<16x32xf32>
    %c0_3 = arith.constant 0 : index
    %c0_4 = arith.constant 0 : index
    %11 = vector.load %arg2[%c0_3, %c0_4] : memref<1x32xf32, #tpu.memory_space<vmem>>, vector<1x32xf32>
    %12 = vector.broadcast %11 : vector<1x32xf32> to vector<16x32xf32>
    %13 = arith.mulf %12, %10 : vector<16x32xf32>
    %c0_5 = arith.constant 0 : index
    %c0_6 = arith.constant 0 : index
    %14 = vector.load %arg3[%c0_5, %c0_6] : memref<16x32xf32, #tpu.memory_space<vmem>>, vector<16x32xf32>
    tpu.vector_store %arg3[%c0_5, %c0_6], %13 {strides = array<i32>} : memref<16x32xf32, #tpu.memory_space<vmem>>, vector<16x32xf32>,
    return
  }
  func.func @transform_0(%arg0: i32) -> (i32, i32) {
    %c0_i32 = arith.constant 0 : i32
    %c0_i32_0 = arith.constant 0 : i32
    return %arg0, %c0_i32 : i32, i32
  }
  func.func @transform_1(%arg0: i32) -> (i32, i32) {
    %c0_i32 = arith.constant 0 : i32
    %c0_i32_0 = arith.constant 0 : i32
    %c0_i32_1 = arith.constant 0 : i32
    return %c0_i32, %c0_i32_0 : i32, i32
  }
  func.func @transform_2(%arg0: i32) -> (i32, i32) {
    %c0_i32 = arith.constant 0 : i32
    %c0_i32_0 = arith.constant 0 : i32
    return %arg0, %c0_i32 : i32, i32
  }
}

</mosaic_0001>

<bundles_post_ra>
// kernel: tpu_custom_call.1
= control target key start
LH: loop header
LB: loop body
LE: loop exit
PB: predicated region body
PF: predicated region fallthrough
CT: control target
= control target key end

     0   :  { %7 = vsyncpa [#allocation3], 0  ;;  %s187_s0 = inlined_call_operand.hbm [shape: f32[16,32], index: 0, kind: input, shape index: {}]   ;;  %s188_s1 = inlined_call_operand.vmem [shape: f32[1,32], index: 1, kind: input, shape index: {}]   ;;  %s189_s2 = inlined_call_operand.hbm [shape: f32[16,32], index: 2, kind: output, shape index: {}]  }
   0x1   :  { %8 = vsyncpa [#allocation4], 0  ;;  %s131_s9 = smov [#allocation2]   ;;  %s83_s13 = scalar_lea.hbm %s187_s0, 256 }
   0x2   :  { %s14_s10 = sshll.u32 %s131_s9, 4  ;;  %p84_p0 = scmp.ne.s32.totalorder %s187_s0, %s83_s13  ;;  %s15_s10 = int_to_ptr.vmem [resolvable:$true] %s14_s10 }
   0x3   :  { %p87_p1 = scmp.lt.u32.totalorder %s83_s13, %s187_s0 }
   0x5   :  { %p89_p2 = pnand %p87_p1, %p84_p0 }
   0x7   :  { %92 = shalt.err (!%p89_p2)
}
   0x8   :  { %s93_s18 = scalar_lea.vmem %s15_s10, 256  ;;  %p98_p4 = scmp.lt.s32.totalorder %s15_s10, %s15_s10 }
   0x9   :  { %p94_p3 = scmp.ne.s32.totalorder %s15_s10, %s93_s18  ;;  %p99_p5 = scmp.lt.s32.totalorder %s93_s18, %s93_s18 }
   0xb   :  { %p100_p6 = por %p99_p5, %p98_p4 }
   0xd   :  { %p101_p7 = pnand %p100_p6, %p94_p3 }
   0xf   :  { %104 = shalt.err (!%p101_p7)
}
  0x10   :  { %s132_s19 = smov 128   ;;  %s133_s20 = smov 8  }
  0x11   :  { %20 = dma.hbm_to_vmem [thread:$0]  %s187_s0, 256, %s15_s10, [#allocation3], %s132_s19, %s132_s19, %s133_s20  }
  0x12   :  { %127 = dma.done.wait [#allocation3], 256  }
  0x13   :  { %128 = vsyncadd [#allocation3], 4294967040  ;;  %v26_v0 = vld [vmem:[#allocation2] sm:$0xff]  ;;  %vm30_vm0 = vcmask 261120   ;;  %v27_v1 = vld [vmem:[#allocation2 + $0x8] sm:$0xff]  ;;  %s134_s24 = smov [#allocation5]  }
  0x14   :  { %v28_v2 = vmul.f32 %v26_v0, %v26_v0  ;;  %v29_v3 = vmul.f32 %v27_v1, %v27_v1  ;;  %v74_v13 = vld [vmem:[%s188_s1] ss:$0 sm:$0xff]  ;;  %s62_s25 = sshll.u32 %s134_s24, 4  ;;  %s63_s25 = int_to_ptr.vmem [resolvable:$true] %s62_s25 }
  0x15   :  { %s105_s26 = scalar_lea.vmem %s63_s25, 256  ;;  %p110_p9 = scmp.lt.s32.totalorder %s63_s25, %s63_s25 }
  0x16   :  { %v31_v4 = vsel %vm30_vm0, %v28_v2, 0.0  ;;  %v34_v5 = vsel %vm30_vm0, %v29_v3, 0.0  ;;  %p106_p8 = scmp.ne.s32.totalorder %s63_s25, %s105_s26  ;;  %p111_p10 = scmp.lt.s32.totalorder %s105_s26, %s105_s26 }
  0x17   :  { %32 = vadd.xlane.f32.xlu0 %v31_v4 }
  0x18   :  { %p112_p11 = por %p111_p10, %p110_p9 }
  0x1a   :  { %p113_p12 = pnand %p112_p11, %p106_p8 }
  0x1b   :  { %35 = vadd.xlane.f32.xlu0 %v34_v5 }
  0xa4   :  { %v33_v6 = vpop.xlane.xlu0 %32 }
  0xa5   :  { %v38_v7 = vmul.f32 0.03125, %v33_v6 }
  0xa7   :  { %v40_v8 = vadd.f32 1e-06, %v38_v7 }
  0xa8   :  { %v36_v9 = vpop.xlane.xlu0 %35 }
  0xa9   :  { %79 = vrsqrt.f32 %v40_v8  ;;  %v39_v10 = vmul.f32 0.03125, %v36_v9 }
  0xab   :  { %v41_v11 = vadd.f32 1e-06, %v39_v10 }
  0xad   :  { %81 = vrsqrt.f32 %v41_v11 }
  0xb3   :  { %v80_v12 = vpop.eup %79 }
  0xb4   :  { %v44_v14 = vmul.f32 %v80_v12, %v26_v0 }
  0xb6   :  { %v53_v15 = vmul.f32 %v74_v13, %v44_v14 }
  0xb7   :  { %v82_v16 = vpop.eup %81 }
  0xb8   :  { %v45_v17 = vmul.f32 %v82_v16, %v27_v1  ;;  %55 = vst.msk [vmem:[#allocation5] sm:$0xff] %vm30_vm0, %v53_v15 }
  0xba   :  { %v54_v18 = vmul.f32 %v74_v13, %v45_v17 }
  0xbc   :  { %56 = vst.msk [vmem:[#allocation5 + $0x8] sm:$0xff] %vm30_vm0, %v54_v18 }
  0xbd   :  { %116 = shalt.err (!%p113_p12)
}
  0xbe   :  { %s117_s28 = scalar_lea.hbm %s189_s2, 256 }
  0xbf   :  { %p118_p13 = scmp.ne.s32.totalorder %s189_s2, %s117_s28  ;;  %p121_p0 = scmp.lt.u32.totalorder %s117_s28, %s189_s2 }
  0xc1   :  { %p123_p1 = pnand %p121_p0, %p118_p13 }
  0xc3   :  { %126 = shalt.err (!%p123_p1)
}
  0xc4   :  { %68 = dma.vmem_to_hbm [thread:$0]  %s63_s25, 256, %s189_s2, [#allocation4], %s132_s19, %s132_s19, %s133_s20  }
  0xc5   :  { %129 = dma.done.wait [#allocation4], 256  }
  0xc6   :  { %130 = vsyncadd [#allocation4], 4294967040 }
  0xc7   :  { %72 = vsyncpa [#allocation3], 1 }
  0xc8   :  { %73 = vsyncpa [#allocation4], 1 }

</bundles_post_ra>
